<compile_context>
chip_gen: v6e
topology: v6e:2x2x1
jax: 0.10.0
libtpu: 0.0.40
codegen_flags: <defaults>
</compile_context>

<pallas_src>
import jax
import jax.numpy as jnp
from jax.experimental import pallas as pl
from jax.experimental.pallas import tpu as pltpu


# ---------------------------------------------------------------------------
# Kernels
# ---------------------------------------------------------------------------
def _hidden(x_ref, w1_ref, b1_ref):
    # Cast x f32 -> bf16 on the VPU (kernel is memory-bound, VPU has huge slack);
    # MXU runs bf16 x bf16 with explicit f32 accumulation.
    xb = x_ref[...].astype(jnp.bfloat16)
    h = jnp.dot(xb, w1_ref[...], preferred_element_type=jnp.float32)   # (rows, 128) f32
    h = h + b1_ref[...]                                                # f32 bias broadcast
    # LeakyReLU(0.01): slope < 1, so max(h, 0.01*h) is exact and is a single VPU op.
    return jnp.maximum(h, 0.01 * h)


def disc_kernel_whole(x_ref, w1_ref, b1_ref, w2_ref, b2_ref, o_ref):
    # Small-batch path: whole-array VMEM blocks, natural (B, 1) output.
    h = _hidden(x_ref, w1_ref, b1_ref)
    # Layer 2 (128 -> 1): VPU multiply + lane reduction (an N=1 MXU matmul wastes 127/255 cols).
    z = jnp.sum(h * w2_ref[...], axis=-1, keepdims=True) + b2_ref[...]  # (B, 1) f32
    # Sigmoid on the EUP: exp + exact EUP reciprocal, off the VALU.
    o_ref[...] = pl.reciprocal(1.0 + jnp.exp(-z))


def disc_kernel_tiled(x_ref, w1_ref, b1_ref, w2c_ref, b2_ref, o_ref):
    # Grid path with lane-dense output.
    h = _hidden(x_ref, w1_ref, b1_ref)                                  # (tile_b, 128) f32
    # Fully (8,128)-aligned XLU transpose (tile_b is a multiple of 128), then a VPU multiply
    # against the (128, 1) weight column and a sublane reduction -> result is naturally a
    # lane-dense (1, tile_b) row, avoiding masked 1-lane stores on the output path.
    hT = h.T                                                            # (128, tile_b)
    z = jnp.sum(hT * w2c_ref[...], axis=0, keepdims=True) + b2_ref[...] # (1, tile_b) f32
    o_ref[...] = pl.reciprocal(1.0 + jnp.exp(-z))[None]                 # (1, 1, tile_b)


# ---------------------------------------------------------------------------
# Wrapper
# ---------------------------------------------------------------------------
def _pick_tile_b(B, D, tile_b):
    if tile_b is not None:
        # Keep user-chosen tiles sublane/lane friendly (multiple of 128 rows).
        return max(128, (int(tile_b) // 128) * 128)
    bytes_per_row = D * 4  # x streamed in f32
    # (a) Double-buffered f32 x tiles under ~12 MiB so v5e's 16 MiB scoped-VMEM default holds.
    cap_vmem = (12 * 1024 * 1024) // max(1, 2 * bytes_per_row)
    # (b) Keep >= ~4 grid steps so v7x's 2 TensorCores both get work from the "parallel" axis,
    #     but never drop below 512 rows (multi-MB tiles amortize the per-step overhead).
    cap_steps = max(512, pl.cdiv(B, 4))
    t = min(4096, cap_vmem, cap_steps)
    return max(128, (t // 128) * 128)


def discriminator_forward(x, w1, b1, w2_row, b2, *, tile_b=None):
    """x: (B, D) f32.  w1: (D, 128) (ideally pre-cast to bf16 once at param prep).
    b1: (1, 128) f32.  w2_row: (1, 128) f32.  b2: (1, 1) f32.  Returns (B, 1) f32."""
    B, D = x.shape
    H = w1.shape[-1]

    if w1.dtype != jnp.bfloat16:
        # Perf: hoist this cast to parameter prep so it is not repeated per training step.
        w1 = w1.astype(jnp.bfloat16)
    b1 = b1.astype(jnp.float32)
    w2_row = w2_row.astype(jnp.float32)
    b2 = b2.astype(jnp.float32)

    if D % 128 != 0:
        # Pad the feature axis to the next lane multiple (zeros don't change x @ w1).
        # Ideally this is done once at data prep / init rather than per call.
        pad = (-D) % 128
        x = jnp.pad(x, ((0, 0), (0, pad)))
        w1 = jnp.pad(w1, ((0, pad), (0, 0)))
        D += pad

    tb = _pick_tile_b(B, D, tile_b)

    if B <= tb:
        # Tiny problem: single invocation, whole-array VMEM residency, no grid bookkeeping.
        return pl.pallas_call(
            disc_kernel_whole,
            out_shape=jax.ShapeDtypeStruct((B, 1), jnp.float32),
            in_specs=[pl.BlockSpec(memory_space=pltpu.MemorySpace.VMEM)] * 5,
            out_specs=pl.BlockSpec(memory_space=pltpu.MemorySpace.VMEM),
        )(x, w1, b1, w2_row, b2)

    # Realistic GAN batch: stream multi-MB row tiles of x, keep weights VMEM-resident across
    # grid steps, shard the batch axis across TensorCores ("parallel").
    num_tiles = pl.cdiv(B, tb)
    w2_col = w2_row.T  # (H, 1) column for the sublane-reduction layer 2 (512 bytes, trivial)

    cost = pl.CostEstimate(
        flops=2 * B * D * H + 4 * B * H,
        transcendentals=2 * B,
        bytes_accessed=B * D * x.dtype.itemsize + D * H * 2 + B * 4 + 4 * (2 * H + 1),
    )
    x_tile_bytes = tb * D * x.dtype.itemsize
    vmem_needed = 2 * x_tile_bytes + 2 * (tb * 4) + D * H * 2 + 4 * (2 * H + 8) + (2 << 20)
    vmem_limit = int(min(max(vmem_needed, 32 << 20), 48 << 20))  # safe on v5e/v6e/v7x

    out_tiles = pl.pallas_call(
        disc_kernel_tiled,
        out_shape=jax.ShapeDtypeStruct((num_tiles, 1, tb), jnp.float32),
        grid=(num_tiles,),
        in_specs=[
            pl.BlockSpec((tb, D), lambda i: (i, 0)),   # x: streamed multi-MB row tiles (f32)
            pl.BlockSpec((D, H), lambda i: (0, 0)),    # w1 (bf16): VMEM-resident
            pl.BlockSpec((1, H), lambda i: (0, 0)),    # b1: resident
            pl.BlockSpec((H, 1), lambda i: (0, 0)),    # w2 column: resident
            pl.BlockSpec((1, 1), lambda i: (0, 0)),    # b2: resident
        ],
        out_specs=pl.BlockSpec((1, 1, tb), lambda i: (i, 0, 0)),  # lane-dense output rows
        compiler_params=pltpu.CompilerParams(
            dimension_semantics=("parallel",),
            vmem_limit_bytes=vmem_limit,
        ),
        cost_estimate=cost,
    )(x, w1, b1, w2_col, b2)

    # Padded rows from a ragged last tile (if any) are dropped here.
    return out_tiles.reshape(-1)[:B].reshape(B, 1)


# ---------------------------------------------------------------------------
# Params / reference
# ---------------------------------------------------------------------------
def init_params(key, img_dim, hidden=128, out=1):
    # Deterministic init mimicking PyTorch Linear's uniform(-1/sqrt(fan_in), 1/sqrt(fan_in)).
    k1, k2, k3, k4 = jax.random.split(key, 4)
    bound1 = 1.0 / jnp.sqrt(img_dim)
    bound2 = 1.0 / jnp.sqrt(hidden)
    # w1 stored transposed to (in, out); w2 kept as PyTorch's (out=1, in=hidden) row vector.
    w1 = jax.random.uniform(k1, (img_dim, hidden), jnp.float32, -bound1, bound1)
    b1 = jax.random.uniform(k2, (1, hidden), jnp.float32, -bound1, bound1)
    w2_row = jax.random.uniform(k3, (out, hidden), jnp.float32, -bound2, bound2)
    b2 = jax.random.uniform(k4, (out, out), jnp.float32, -bound2, bound2)
    return w1, b1, w2_row, b2


def reference_forward(x, w1, b1, w2_row, b2):
    # Full-f32 reference of the PyTorch module.
    h = x @ w1 + b1
    h = jnp.where(h > 0, h, 0.01 * h)
    z = h @ w2_row.T + b2
    return jax.nn.sigmoid(z)


if __name__ == "__main__":
    key = jax.random.PRNGKey(0)
    B, IMG_DIM = 8, 256  # small, tile-aligned shapes consistent with a flat-image Linear input
    kx, kp = jax.random.split(key)
    x = jax.random.normal(kx, (B, IMG_DIM), jnp.float32)
    w1, b1, w2_row, b2 = init_params(kp, IMG_DIM)
    # Hoisted once, per perf review: keep the bf16 copy of w1 with the parameters.
    w1_bf = w1.astype(jnp.bfloat16)

    # 1) Small-batch path (no grid, whole-array VMEM blocks).
    out = jax.block_until_ready(discriminator_forward(x, w1_bf, b1, w2_row, b2))
    ref = reference_forward(x, w1, b1, w2_row, b2)
    assert out.shape == (B, 1)
    # bf16 matmul inputs -> loosened tolerance vs the f32 reference (fine for a GAN forward).
    assert jnp.allclose(out, ref, atol=2e-2), float(jnp.max(jnp.abs(out - ref)))

    # 2) Batch-tiled path (weight-stationary, "parallel" batch axis, lane-dense output).
    B2 = 4096
    x2 = jax.random.normal(jax.random.PRNGKey(1), (B2, IMG_DIM), jnp.float32)
    out2 = jax.block_until_ready(discriminator_forward(x2, w1_bf, b1, w2_row, b2))
    ref2 = reference_forward(x2, w1, b1, w2_row, b2)
    assert out2.shape == (B2, 1)
    assert jnp.allclose(out2, ref2, atol=2e-2), float(jnp.max(jnp.abs(out2 - ref2)))

    # 3) Ragged tail (B % tile_b != 0): last tile computes on garbage rows, sliced away after.
    B3 = 1000
    x3 = jax.random.normal(jax.random.PRNGKey(2), (B3, IMG_DIM), jnp.float32)
    out3 = jax.block_until_ready(
        discriminator_forward(x3, w1_bf, b1, w2_row, b2, tile_b=256))
    ref3 = reference_forward(x3, w1, b1, w2_row, b2)
    assert out3.shape == (B3, 1)
    assert jnp.allclose(out3, ref3, atol=2e-2), float(jnp.max(jnp.abs(out3 - ref3)))

    print("KERNEL_OK")
</pallas_src>

<mosaic_0001>
module attributes {stable_mosaic.version = 11 : i64} {
  func.func @disc_kernel_whole(%arg0: memref<8x256xf32, #tpu.memory_space<vmem>>, %arg1: memref<256x128xbf16, #tpu.memory_space<vmem>>, %arg2: memref<1x128xf32, #tpu.memory_space<vmem>>, %arg3: memref<1x128xf32, #tpu.memory_space<vmem>>, %arg4: memref<1x1xf32, #tpu.memory_space<vmem>>, %arg5: memref<8x1xf32, #tpu.memory_space<vmem>>) attributes {dimension_semantics = [], scalar_prefetch = 0 : i64, scratch_operands = 0 : i64, tpu.core_type = #tpu.core_type<tc>} {
    %c0 = arith.constant 0 : index
    %c0_0 = arith.constant 0 : index
    %0 = vector.load %arg0[%c0, %c0_0] : memref<8x256xf32, #tpu.memory_space<vmem>>, vector<8x256xf32>
    %1 = arith.truncf %0 : vector<8x256xf32> to vector<8x256xbf16>
    %c0_1 = arith.constant 0 : index
    %c0_2 = arith.constant 0 : index
    %2 = vector.load %arg1[%c0_1, %c0_2] : memref<256x128xbf16, #tpu.memory_space<vmem>>, vector<256x128xbf16>
    %cst = arith.constant dense<0.000000e+00> : vector<8x128xf32>
    %3 = tpu.matmul %1, %2, %cst {dimension_numbers = #tpu.dot_dimension_numbers<[1], [0], [0], [1], [0, 0, 1, 1], [], []>} : vector<8x256xbf16>, vector<256x128xbf16>, vector<8x128xf32> -> vector<8x128xf32>
    %c0_3 = arith.constant 0 : index
    %c0_4 = arith.constant 0 : index
    %4 = vector.load %arg2[%c0_3, %c0_4] : memref<1x128xf32, #tpu.memory_space<vmem>>, vector<1x128xf32>
    %5 = vector.broadcast %4 : vector<1x128xf32> to vector<8x128xf32>
    %6 = arith.addf %3, %5 : vector<8x128xf32>
    %cst_5 = arith.constant 0.00999999977 : f32
    %7 = vector.broadcast %cst_5 : f32 to vector<8x128xf32>
    %8 = arith.mulf %7, %6 : vector<8x128xf32>
    %9 = arith.maximumf %6, %8 : vector<8x128xf32>
    %c0_6 = arith.constant 0 : index
    %c0_7 = arith.constant 0 : index
    %10 = vector.load %arg3[%c0_6, %c0_7] : memref<1x128xf32, #tpu.memory_space<vmem>>, vector<1x128xf32>
    %11 = vector.broadcast %10 : vector<1x128xf32> to vector<8x128xf32>
    %12 = arith.mulf %9, %11 : vector<8x128xf32>
    %cst_8 = arith.constant dense<0.000000e+00> : vector<8xf32>
    %13 = vector.multi_reduction <add>, %12, %cst_8 [1] : vector<8x128xf32> to vector<8xf32>
    %14 = vector.shape_cast %13 : vector<8xf32> to vector<8x1xf32>
    %c0_9 = arith.constant 0 : index
    %c0_10 = arith.constant 0 : index
    %15 = vector.load %arg4[%c0_9, %c0_10] : memref<1x1xf32, #tpu.memory_space<vmem>>, vector<1x1xf32>
    %16 = vector.broadcast %15 : vector<1x1xf32> to vector<8x1xf32>
    %17 = arith.addf %14, %16 : vector<8x1xf32>
    %cst_11 = arith.constant 0.000000e+00 : f32
    %18 = vector.broadcast %cst_11 : f32 to vector<8x1xf32>
    %19 = arith.subf %18, %17 : vector<8x1xf32>
    %20 = math.exp %19 : vector<8x1xf32>
    %cst_12 = arith.constant 1.000000e+00 : f32
    %21 = vector.broadcast %cst_12 : f32 to vector<8x1xf32>
    %22 = arith.addf %21, %20 : vector<8x1xf32>
    %23 = tpu.reciprocal %22 : vector<8x1xf32> -> vector<8x1xf32>
    %c0_13 = arith.constant 0 : index
    %c0_14 = arith.constant 0 : index
    %24 = vector.load %arg5[%c0_13, %c0_14] : memref<8x1xf32, #tpu.memory_space<vmem>>, vector<8x1xf32>
    tpu.vector_store %arg5[%c0_13, %c0_14], %23 {strides = array<i32>} : memref<8x1xf32, #tpu.memory_space<vmem>>, vector<8x1xf32>,
    return
  }
}

</mosaic_0001>

<bundles_post_ra>
// kernel: tpu_custom_call.1
= control target key start
LH: loop header
LB: loop body
LE: loop exit
PB: predicated region body
PF: predicated region fallthrough
CT: control target
= control target key end

     0   :  { %s422_s0 = inlined_call_operand.hbm [shape: f32[8,256], index: 0, kind: input, shape index: {}]   ;;  %s423_s1 = inlined_call_operand.hbm [shape: bf16[256,128], index: 1, kind: input, shape index: {}]   ;;  %s424_s2 = inlined_call_operand.vmem [shape: f32[1,128], index: 2, kind: input, shape index: {}]   ;;  %s425_s3 = inlined_call_operand.vmem [shape: f32[1,128], index: 3, kind: input, shape index: {}]   ;;  %s426_s4 = inlined_call_operand.<no memory space> [shape: f32[1,1], index: 4, kind: input, shape index: {}]   ;;  %s427_s5 = inlined_call_operand.vmem [shape: f32[8,1], index: 5, kind: output, shape index: {}]  }
   0x1   :  { %v10_v0 = vstv %s426_s4 }
   0x2   :  { %11 = vst [vmem:[#allocation2] sm:$0x1] %v10_v0 }
   0x3   :  { %12 = vsyncpa [#allocation4], 0 }
   0x4   :  { %13 = vsyncpa [#allocation6], 0  ;;  %s370_s20 = smov [#allocation3]   ;;  %s371_s22 = smov [#allocation5]  }
   0x5   :  { %s20_s21 = sshll.u32 %s370_s20, 4  ;;  %s29_s23 = sshll.u32 %s371_s22, 4  ;;  %s21_s21 = int_to_ptr.vmem [resolvable:$true] %s20_s21  ;;  %s30_s23 = int_to_ptr.vmem [resolvable:$true] %s29_s23 }
   0x6   :  { %s334_s24 = scalar_lea.vmem %s21_s21, 256  ;;  %p339_p1 = scmp.lt.s32.totalorder %s21_s21, %s21_s21 }
   0x7   :  { %p335_p0 = scmp.ne.s32.totalorder %s21_s21, %s334_s24  ;;  %p340_p2 = scmp.lt.s32.totalorder %s334_s24, %s334_s24 }
   0x9   :  { %p341_p3 = por %p340_p2, %p339_p1 }
   0xb   :  { %p342_p4 = pnand %p341_p3, %p335_p0 }
   0xd   :  { %345 = shalt.err (!%p342_p4)
}
   0xe   :  { %23 = dma.hbm_to_vmem [thread:$0]  %s422_s0, 256, %s21_s21, [#allocation4]  }
   0xf   :  { %s354_s4 = scalar_lea.vmem %s30_s23, 2048  ;;  %p359_p6 = scmp.lt.s32.totalorder %s30_s23, %s30_s23 }
  0x10   :  { %p355_p5 = scmp.ne.s32.totalorder %s30_s23, %s354_s4  ;;  %p360_p7 = scmp.lt.s32.totalorder %s354_s4, %s354_s4 }
  0x12   :  { %p361_p8 = por %p360_p7, %p359_p6 }
  0x14   :  { %p362_p9 = pnand %p361_p8, %p355_p5 }
  0x16   :  { %365 = shalt.err (!%p362_p9)
}
  0x17   :  { %s372_s27 = smov 64   ;;  %s373_s28 = smov 4  }
  0x18   :  { %35 = dma.hbm_to_vmem [thread:$0]  %s423_s1, 2048, %s30_s23, [#allocation6], %s372_s27, %s372_s27, %s373_s28  }
  0x19   :  { %366 = dma.done.wait [#allocation4], 256  }
  0x1a   :  { %367 = vsyncadd [#allocation4], 4294967040 }
  0x1b   :  { %368 = dma.done.wait [#allocation6], 2048  }
  0x1c   :  { %369 = vsyncadd [#allocation6], 4294965248  ;;  %v306_v1 = vld [vmem:[#allocation5 + $0x78] sm:$0xff]   ;;  %v308_v3 = vld [vmem:[#allocation5 + $0x70] sm:$0xff]   ;;  %vm253_vm0 = vcmask 7168  }
  0x1d   :  { %v307_v2 = vld [vmem:[#allocation5 + $0x38] sm:$0xff]   ;;  %280 = vmatprep.subr.bf16.mxu0 %v306_v1  ;;  %v309_v4 = vld [vmem:[#allocation5 + $0x30] sm:$0xff]   ;;  %v310_v5 = vld [vmem:[#allocation5 + $0x68] sm:$0xff]  }
  0x1e   :  { %281 = vmatpush3.bf16.msra.mxu0 %v307_v2  ;;  %v311_v6 = vld [vmem:[#allocation5 + $0x28] sm:$0xff]   ;;  %v312_v7 = vld [vmem:[#allocation5 + $0x60] sm:$0xff]   ;;  %v314_v9 = vld [vmem:[#allocation5 + $0x58] sm:$0xff]  }
  0x1f   :  { %282 = vmatprep.subr.bf16.mxu0 %v308_v3  ;;  %v313_v8 = vld [vmem:[#allocation5 + $0x20] sm:$0xff]   ;;  %v315_v10 = vld [vmem:[#allocation5 + $0x18] sm:$0xff]   ;;  %v316_v11 = vld [vmem:[#allocation5 + $0x50] sm:$0xff]  }
  0x20   :  { %v50_v12 = vld [vmem:[#allocation3 + $0x8] sm:$0xff]  ;;  %v317_v14 = vld [vmem:[#allocation5 + $0x10] sm:$0xff]   ;;  %v318_v15 = vld [vmem:[#allocation5 + $0x48] sm:$0xff]  }
  0x21   :  { %v52_v13 = vpack.c.bf16 %v50_v12, %v50_v12  ;;  %v319_v16 = vld [vmem:[#allocation5 + $0x8] sm:$0xff]   ;;  %v320_v17 = vld [vmem:[#allocation5 + $0x40] sm:$0xff]   ;;  %v49_v19 = vld [vmem:[#allocation3] sm:$0xff] }
  0x22   :  { %283 = vmatpush3.bf16.msra.mxu0 %v309_v4  ;;  %v321_v18 = vld [vmem:[#allocation5] sm:$0xff]   ;;  %v51_v20 = vpack.c.bf16 %v49_v19, %v49_v19  ;;  %v261_v22 = vld [vmem:[%s424_s2] ss:$0 sm:$0xff] }
  0x23   :  { %284 = vmatprep.subr.bf16.mxu0 %v310_v5  ;;  %220 = vmatprep.mubr.bf16.mxu0 %v52_v13  ;;  %v278_v29 = vld [vmem:[%s425_s3] ss:$0 sm:$0xff] }
  0x24   :  { %v279_v32 = vld [vmem:[#allocation2] ss:$0 sm:$0xff] }
  0x26   :  { %285 = vmatpush3.bf16.msra.mxu0 %v311_v6 }
  0x27   :  { %286 = vmatprep.subr.bf16.mxu0 %v312_v7 }
  0x2a   :  { %287 = vmatpush3.bf16.msra.mxu0 %v313_v8 }
  0x2b   :  { %288 = vmatprep.subr.bf16.mxu0 %v314_v9 }
  0x2e   :  { %289 = vmatpush3.bf16.msra.mxu0 %v315_v10 }
  0x2f   :  { %290 = vmatprep.subr.bf16.mxu0 %v316_v11 }
  0x32   :  { %291 = vmatpush3.bf16.msra.mxu0 %v317_v14 }
  0x33   :  { %292 = vmatprep.subr.bf16.mxu0 %v318_v15 }
  0x36   :  { %293 = vmatpush3.bf16.msra.mxu0 %v319_v16 }
  0x37   :  { %294 = vmatprep.subr.bf16.mxu0 %v320_v17 }
  0x3a   :  { %295 = vmatpush3.bf16.msra.mxu0 %v321_v18 }
  0x3d   :  { %221 = vmatmul.mubr.bf16.vlgmr.msra.gmra.mxu0 %v51_v20 }
  0xfd   :  { %v296_v21 = vpop.f32.mrf.mxu0 }
  0xff   :  { %v297_v23 = vpop.f32.mrf.mxu0 }
 0x100   :  { %v298_v24 = vadd.f32 %v297_v23, %v296_v21 }
 0x101   :  { %v299_v25 = vpop.f32.mrf.mxu0 }
 0x102   :  { %v223_v26 = vadd.f32 %v298_v24, %v261_v22 }
 0x103   :  { %v300_v27 = vpop.f32.mrf.mxu0 }
 0x104   :  { %v228_v28 = vmul.f32 0.01, %v223_v26 }
 0x106   :  { %v229_v30 = vmax.f32 %v223_v26, %v228_v28 }
 0x108   :  { %v237_v31 = vmul.f32 %v278_v29, %v229_v30 }
 0x10a   :  { %238 = vadd.xlane.f32.xlu0 %v237_v31 }
 0x193   :  { %v239_v33 = vpop.xlane.xlu0 %238 }
 0x194   :  { %v247_v34 = vadd.f32 %v279_v32, %v239_v33 }
 0x196   :  { %v248_v35 = vsub.f32 0.0, %v247_v34 }
 0x198   :  { %v249_v36 = vmul.f32 1.442695, %v248_v35 }
 0x19a   :  { %322 = vpow2.f32 %v249_v36 }
 0x1a7   :  { %v323_v37 = vpop.eup %322 }
 0x1a8   :  { %v251_v38 = vadd.f32 1.0, %v323_v37 }
 0x1aa   :  { %324 = vrcp.f32 %v251_v38 }
 0x1b7   :  { %v325_v39 = vpop.eup %324 }
 0x1b8   :  { %254 = vst.msk [vmem:[%s427_s5] sm:$0xff] %vm253_vm0, %v325_v39 }
 0x1b9   :  { %259 = vsyncpa [#allocation4], 1 }
 0x1ba   :  { %260 = vsyncpa [#allocation6], 1 }

</bundles_post_ra>
